<compile_context>
chip_gen: v5e
topology: v5e:2x2
jax: 0.10.0
libtpu: 0.0.40
codegen_flags: <defaults>
</compile_context>

<pallas_src>
import functools

import jax
import jax.numpy as jnp
from jax.experimental import pallas as pl
from jax.experimental.pallas import tpu as pltpu


_VMEM_LIMIT_BYTES = 48 * 1024 * 1024   # <= v7x 64 MiB physical, > v5e 16 MiB default
_VMEM_TILE_BUDGET = 32 * 1024 * 1024   # headroom for double-buffered tiles


def _round_up(x, m):
    return ((x + m - 1) // m) * m


def _choose_ent_tile(n_ent, rank, batch_tile, budget_bytes):
    """Largest entity tile (multiple of 128) that fits VMEM and keeps >=2 grid steps."""
    for t in (4096, 2048, 1024, 512, 256, 128):
        steps = (n_ent + t - 1) // t
        if steps < 2 and t > 128 and n_ent > 128:
            # keep >= 2 "parallel" entity steps so v7x's 2 TCs both get work
            continue
        vmem = (2 * (rank * t * 2)          # E^T tile, bf16, double-buffered
                + 2 * (batch_tile * t * 4)  # out tile, f32, double-buffered
                + 2 * (batch_tile * rank * 2))  # q tile, bf16, double-buffered
        if vmem <= budget_bytes:
            return t
    return 128


def _distmult_scores_kernel(q_ref, entT_ref, out_ref):
    # q tile: (tb, R); E^T tile: (R, ent_tile); out tile: (tb, ent_tile).
    # No cross-iteration state -> both grid axes are "parallel".
    out_ref[...] = jnp.dot(
        q_ref[...], entT_ref[...], preferred_element_type=jnp.float32
    ).astype(out_ref.dtype)


@functools.partial(jax.jit, static_argnames=("n_ent", "ent_tile", "batch_tile"))
def distmult_scores(q, ent_T, *, n_ent, ent_tile, batch_tile):
    """q = lhs*rel: (B, R) f32.  ent_T: cached (R, N_pad) bf16.  Returns (B, n_ent) f32."""
    B, R = q.shape
    R2, n_pad = ent_T.shape
    assert R == R2 and n_pad % ent_tile == 0

    # Batch tiling: pad B up to a multiple of the batch tile (>= 8 for sublanes).
    tb = min(batch_tile, _round_up(B, 8))
    b_pad = _round_up(B, tb)

    q_c = q.astype(ent_T.dtype)
    if b_pad != B:
        q_c = jnp.pad(q_c, ((0, b_pad - B), (0, 0)))

    grid = (b_pad // tb, n_pad // ent_tile)

    out = pl.pallas_call(
        _distmult_scores_kernel,
        out_shape=jax.ShapeDtypeStruct((b_pad, n_pad), jnp.float32),
        grid_spec=pltpu.PrefetchScalarGridSpec(
            num_scalar_prefetch=0,
            grid=grid,
            in_specs=[
                pl.BlockSpec((tb, R), lambda i, j: (i, 0)),          # q (resident per batch tile)
                pl.BlockSpec((R, ent_tile), lambda i, j: (0, j)),    # E^T tile (streamed)
            ],
            out_specs=pl.BlockSpec((tb, ent_tile), lambda i, j: (i, j)),
        ),
        compiler_params=pltpu.CompilerParams(
            dimension_semantics=("parallel", "parallel"),   # state-free -> megacore OK
            vmem_limit_bytes=_VMEM_LIMIT_BYTES,
        ),
    )(q_c, ent_T)

    return out[:B, :n_ent]


class DistmultJax:
    """Deterministically-initialized DistMult params + Pallas forward."""

    def __init__(self, sizes, rank, init_size=0.001, seed=0,
                 table_dtype=jnp.bfloat16, batch_tile=256):
        self.sizes = sizes
        self.rank = rank
        self.n_ent = sizes[0]
        self.batch_tile = batch_tile

        k0, k1 = jax.random.split(jax.random.PRNGKey(seed))
        # Matches PyTorch: nn.Embedding default N(0,1) init scaled by init_size.
        self.ent_weight = init_size * jax.random.normal(
            k0, (sizes[0], rank), jnp.float32
        )
        self.rel_weight = init_size * jax.random.normal(
            k1, (sizes[1], rank), jnp.float32
        )

        # Tile selection + one-time cache of the transposed/cast/zero-padded table.
        self.ent_tile = _choose_ent_tile(self.n_ent, rank, batch_tile, _VMEM_TILE_BUDGET)
        n_pad = _round_up(self.n_ent, self.ent_tile)
        ent_T = self.ent_weight.T.astype(table_dtype)                 # (R, N)
        self.ent_T = jax.block_until_ready(
            jnp.pad(ent_T, ((0, 0), (0, n_pad - self.n_ent)))         # (R, N_pad)
        )

    def forward(self, x):
        # x: (B, 3) int32 triples (lhs_idx, rel_idx, rhs_idx)
        lhs = jnp.take(self.ent_weight, x[:, 0], axis=0)   # (B, R)
        rel = jnp.take(self.rel_weight, x[:, 1], axis=0)   # (B, R)
        rhs = jnp.take(self.ent_weight, x[:, 2], axis=0)   # (B, R)
        q = lhs * rel                                      # tiny elementwise, hoisted
        scores = distmult_scores(
            q, self.ent_T,
            n_ent=self.n_ent, ent_tile=self.ent_tile, batch_tile=self.batch_tile,
        )                                                  # (B, N) f32 via Pallas
        return scores, (lhs, rel, rhs)

    def score(self, x):
        lhs = jnp.take(self.ent_weight, x[:, 0], axis=0)
        rel = jnp.take(self.rel_weight, x[:, 1], axis=0)
        rhs = jnp.take(self.ent_weight, x[:, 2], axis=0)
        return jnp.sum(lhs * rel * rhs, axis=1, keepdims=True)

    def get_queries(self, queries):
        return (jnp.take(self.ent_weight, queries[:, 0], axis=0)
                * jnp.take(self.rel_weight, queries[:, 1], axis=0))

    def get_rhs(self, chunk_begin, chunk_size):
        return self.ent_weight[chunk_begin:chunk_begin + chunk_size].T

    # TODO(synk): get_ranking (host-side filtered ranking loop over a Python dict
    # of filters) is inherently host code and is not translated to Pallas.


if __name__ == "__main__":
    # Non-multiple entity count exercises the padded, multi-tile entity grid
    # (500 -> n_pad 512, ent_tile 256 -> 2 parallel entity steps), and a
    # non-multiple batch exercises batch padding (10 -> 16).
    sizes = (500, 16, 500)
    rank = 128
    batch = 10

    model = DistmultJax(sizes, rank, init_size=0.001, seed=0)

    key = jax.random.PRNGKey(0)
    kl, kr, kt = jax.random.split(key, 3)
    x = jnp.stack(
        [
            jax.random.randint(kl, (batch,), 0, sizes[0]),
            jax.random.randint(kr, (batch,), 0, sizes[1]),
            jax.random.randint(kt, (batch,), 0, sizes[2]),
        ],
        axis=1,
    ).astype(jnp.int32)

    scores, (lhs, rel, rhs) = model.forward(x)
    scores = jax.block_until_ready(scores)
    assert scores.shape == (batch, sizes[0])

    # Reference matching the kernel's compute path (bf16 operands, f32 accumulation).
    q = lhs * rel
    ref_bf16 = jnp.dot(
        q.astype(jnp.bfloat16),
        model.ent_weight.T.astype(jnp.bfloat16),
        preferred_element_type=jnp.float32,
    )
    assert jnp.allclose(scores, ref_bf16, rtol=2e-2, atol=1e-10)

    # Coarse check against full-f32 DistMult semantics.
    ref_f32 = q @ model.ent_weight.T
    assert jnp.allclose(scores, ref_f32, rtol=1e-1, atol=2e-9)

    # Sanity-check the other model methods stay consistent with each other.
    s = model.score(x)
    assert s.shape == (batch, 1)

    print("KERNEL_OK")
</pallas_src>

<mosaic_0001>
module attributes {stable_mosaic.version = 11 : i64} {
  func.func @_distmult_scores_kernel(%arg0: i32, %arg1: i32, %arg2: memref<16x128xbf16, #tpu.memory_space<vmem>>, %arg3: memref<128x256xbf16, #tpu.memory_space<vmem>>, %arg4: memref<16x256xf32, #tpu.memory_space<vmem>>) attributes {dimension_semantics = [#tpu.dimension_semantics<parallel>, #tpu.dimension_semantics<parallel>], iteration_bounds = array<i64: 1, 2>, scalar_prefetch = 0 : i64, scratch_operands = 0 : i64, tpu.core_type = #tpu.core_type<tc>, window_params = [{transform_indices = @transform_0, window_bounds = array<i64: 16, 128>}, {transform_indices = @transform_1, window_bounds = array<i64: 128, 256>}, {transform_indices = @transform_2, window_bounds = array<i64: 16, 256>}]} {
    %c0 = arith.constant 0 : index
    %c0_0 = arith.constant 0 : index
    %0 = vector.load %arg2[%c0, %c0_0] : memref<16x128xbf16, #tpu.memory_space<vmem>>, vector<16x128xbf16>
    %c0_1 = arith.constant 0 : index
    %c0_2 = arith.constant 0 : index
    %1 = vector.load %arg3[%c0_1, %c0_2] : memref<128x256xbf16, #tpu.memory_space<vmem>>, vector<128x256xbf16>
    %cst = arith.constant dense<0.000000e+00> : vector<16x256xf32>
    %2 = tpu.matmul %0, %1, %cst {dimension_numbers = #tpu.dot_dimension_numbers<[1], [0], [0], [1], [0, 0, 1, 1], [], []>} : vector<16x128xbf16>, vector<128x256xbf16>, vector<16x256xf32> -> vector<16x256xf32>
    %c0_3 = arith.constant 0 : index
    %c0_4 = arith.constant 0 : index
    %3 = vector.load %arg4[%c0_3, %c0_4] : memref<16x256xf32, #tpu.memory_space<vmem>>, vector<16x256xf32>
    tpu.vector_store %arg4[%c0_3, %c0_4], %2 {strides = array<i32>} : memref<16x256xf32, #tpu.memory_space<vmem>>, vector<16x256xf32>,
    return
  }
  func.func @transform_0(%arg0: i32, %arg1: i32) -> (i32, i32) {
    %c0_i32 = arith.constant 0 : i32
    %c0_i32_0 = arith.constant 0 : i32
    return %arg0, %c0_i32 : i32, i32
  }
  func.func @transform_1(%arg0: i32, %arg1: i32) -> (i32, i32) {
    %c0_i32 = arith.constant 0 : i32
    %c0_i32_0 = arith.constant 0 : i32
    return %c0_i32, %arg1 : i32, i32
  }
  func.func @transform_2(%arg0: i32, %arg1: i32) -> (i32, i32) {
    %c0_i32 = arith.constant 0 : i32
    return %arg0, %arg1 : i32, i32
  }
}

</mosaic_0001>

<bundles_post_ra>
// kernel: distmult_scores.1
= control target key start
LH: loop header
LB: loop body
LE: loop exit
PB: predicated region body
PF: predicated region fallthrough
CT: control target
= control target key end

     0   :  { %7 = vsyncpa [#allocation3], 0  ;;  %s921_s0 = inlined_call_operand.vmem [shape: bf16[16,128], index: 0, kind: input, shape index: {}]   ;;  %s922_s1 = inlined_call_operand.hbm [shape: bf16[128,512], index: 1, kind: input, shape index: {}]   ;;  %s923_s2 = inlined_call_operand.hbm [shape: f32[16,512], index: 2, kind: output, shape index: {}]  }
   0x1   :  { %9 = vsyncpa [#allocation3 + $0x1], 0 }
   0x2   :  { %10 = vsyncpa [#allocation4], 0 }
   0x3   :  { %12 = vsyncpa [#allocation4 + $0x1], 0  ;;  %s763_s9 = smov 0   ;;  %s765_s10 = smov 0  }
   0x4   :  { %s767_s11 = smov 0   ;;  %s769_s12 = smov 0  }
   0x5   :  { %s771_s13 = smov 0   ;;  %s773_s14 = smov 0  }
   0x6 LB: > { %s457_s15 = sadd.s32 4294967295, %s740_s14   ;;  %s458_s16 = sadd.s32 4294967294, %s740_s14   ;;  %s740_s14 = sphi %s773_s14, %s18_s14   ;;  %s736_s13 = sphi %s771_s13, %s932_s13   ;;  %s732_s12 = sphi %s769_s12, %s931_s12   ;;  %s728_s11 = sphi %s767_s11, %s930_s11   ;;  %s724_s10 = sphi %s765_s10, %s929_s10   ;;  %s720_s9 = sphi %s763_s9, %s928_s9  }
   0x7   : > { %s27_s17 = sadd.s32 1, %s736_s13  ;;  %s63_s18 = sadd.s32 1, %s728_s11 }
   0x8   : > { %p28_p0 = scmp.ge.s32.totalorder %s27_s17, 2  ;;  %p70_p1 = scmp.ne.s32.totalorder %s728_s11, %s724_s10 }
   0x9   : > { %p71_p2 = scmp.eq.s32.totalorder %s740_s14, 0  ;;  %p76_p3 = scmp.ne.s32.totalorder %s724_s10, %s720_s9 }
   0xa   : > { %s934_s17 = smov (%p28_p0, %s27_s17), 0  ;;  %p77_p5 = scmp.eq.s32.totalorder %s457_s15, 0 }
   0xb   : > { %p804_p4 = por %p71_p2, %p70_p1  ;;  %s60_s20 = ssub.s32 %s736_s13, %s934_s17 }
   0xc   : > { %p102_p6 = scmp.eq.s32.totalorder %s457_s15, 1  ;;  %p61_p7 = scmp.eq.s32.totalorder %s60_s20, 0 }
   0xd   : > { %p810_p8 = por %p77_p5, %p76_p3  ;;  %p108_p10 = scmp.eq.s32.totalorder %s458_s16, 1 }
   0xe   : > { %p814_p9 = por %p102_p6, %p70_p1  ;;  %p461_p12 = scmp.ge.s32.totalorder %s740_s14, 2 }
   0xf   : > { %s819_s23 = scalar_select %p61_p7, %s728_s11, %s63_s18  }
  0x10   : > { %p821_p11 = por %p108_p10, %p76_p3  ;;  %p572_p13 = scmp.lt.s32.totalorder %s740_s14, 2 }
  0x11   : > { %s137_s25 = sand.u32 1, %s728_s11   ;;  %s541_s27 = sshll.u32 %s736_s13, 3 }
  0x12   : > { %s462_s26 = sshll.u32 %s137_s25, 7  ;;  %s146_s30 = scalar_lea.hbm %s922_s1, %s541_s27 }
  0x13   : > { %s141_s3 = scalar_lea.vmem [#allocation2], %s462_s26  ;;  %s147_s5 = sshll.u32 %s146_s30, 4  ;;  %s148_s5 = int_to_ptr.hbm [resolvable:$true] %s147_s5 }
  0x14   : > { %s149_s4 = sshll.u32 %s141_s3, 4  ;;  %p565_p0 = pnand %p572_p13, %p804_p4  ;;  %s150_s4 = int_to_ptr.vmem [resolvable:$true] %s149_s4 }
  0x15   : > { %s138_s6 = scalar_lea.sflag [#allocation3], %s137_s25  ;;  %s742_s7 = smov 256  }
  0x16   : > { %s743_s8 = smov 128   ;;  %s744_s15 = smov 8  }
  0x17   : > { %567 = dma.hbm_to_vmem [thread:$0]  (!%p565_p0), %s148_s5, 2048, %s150_s4, %s138_s6, %s742_s7, %s743_s8, %s744_s15  }
  0x18   : > { %p465_p1 = scmp.ge.s32.totalorder %s740_s14, 1  ;;  %p157_p2 = scmp.lt.s32.totalorder %s740_s14, 3 }
  0x1a   : > { %p158_p3 = pnand %p465_p1, %p157_p2 }
  0x1b   : > { %s837_s16 = sand.u32 (!%p158_p3), 1, %s724_s10  }
  0x1c   : > { %161 = sbr.rel (%p158_p3) target bundleno = 208 (0xd0), region = 28  ;;  %s466_s18 = sshll.u32 (!%p158_p3), %s837_s16, 7 }
  0x1d   : > { %s164_s20 = scalar_lea.sflag (!%p158_p3), [#allocation3], %s837_s16  ;;  %s841_s26 = scalar_lea.vmem (!%p158_p3), [#allocation2], %s466_s18 }
  0x21   : > { %711 = dma.done.wait (%p810_p8), %s164_s20, 2048  }
  0x22   : > { %713 = vsyncadd (%p810_p8), %s164_s20, 4294965248  ;;  %v530_v0 = vld [vmem:[%s841_s26 + $0x70] sm:$0xf]  ;;  %v558_v1 = vld [vmem:[%s841_s26 + $0x74] sm:$0xf0]  ;;  %s467_s25 = sshll.u32 %s837_s16, 5 }
  0x23   : > { %v557_v2 = vld [vmem:[%s841_s26 + $0x74] sm:$0xf]  ;;  %v531_v3 = vor.u32 %v558_v1, %v530_v0  ;;  %v532_v4 = vld [vmem:[%s841_s26 + $0x78] sm:$0xf0]  ;;  %v522_v5 = vld [vmem:[%s841_s26 + $0x60] sm:$0xf] }
  0x24   : > { %v556_v6 = vld [vmem:[%s841_s26 + $0x64] sm:$0xf0]  ;;  %v535_v7 = vor.u32 %v557_v2, %v532_v4  ;;  %v555_v8 = vld [vmem:[%s841_s26 + $0x64] sm:$0xf]  ;;  %v524_v9 = vld [vmem:[%s841_s26 + $0x68] sm:$0xf0] }
  0x25   : > { %307 = vmatpush.bf16.msra.mxu0 %v531_v3  ;;  %v523_v10 = vor.u32 %v556_v6, %v522_v5  ;;  %v527_v11 = vor.u32 %v555_v8, %v524_v9  ;;  %v514_v12 = vld [vmem:[%s841_s26 + $0x50] sm:$0xf]  ;;  %v554_v13 = vld [vmem:[%s841_s26 + $0x54] sm:$0xf0]  ;;  %v553_v14 = vld [vmem:[%s841_s26 + $0x54] sm:$0xf] }
  0x26   : > { %321 = vmatpush.bf16.msra.mxu1 %v535_v7  ;;  %v516_v15 = vld [vmem:[%s841_s26 + $0x58] sm:$0xf0]  ;;  %v515_v16 = vor.u32 %v554_v13, %v514_v12  ;;  %v506_v18 = vld [vmem:[%s841_s26 + $0x40] sm:$0xf]  ;;  %v552_v19 = vld [vmem:[%s841_s26 + $0x44] sm:$0xf0] }
  0x27   : > { %v519_v17 = vor.u32 %v553_v14, %v516_v15  ;;  %v551_v20 = vld [vmem:[%s841_s26 + $0x44] sm:$0xf]  ;;  %v508_v21 = vld [vmem:[%s841_s26 + $0x48] sm:$0xf0]  ;;  %v507_v22 = vor.u32 %v552_v19, %v506_v18  ;;  %v498_v24 = vld [vmem:[%s841_s26 + $0x30] sm:$0xf] }
  0x28   : > { %v511_v23 = vor.u32 %v551_v20, %v508_v21  ;;  %v550_v25 = vld [vmem:[%s841_s26 + $0x34] sm:$0xf0]  ;;  %v549_v26 = vld [vmem:[%s841_s26 + $0x34] sm:$0xf]  ;;  %v500_v27 = vld [vmem:[%s841_s26 + $0x38] sm:$0xf0] }
  0x29   : > { %308 = vmatpush.bf16.msra.mxu0 %v523_v10  ;;  %v499_v28 = vor.u32 %v550_v25, %v498_v24  ;;  %v503_v29 = vor.u32 %v549_v26, %v500_v27  ;;  %v490_v30 = vld [vmem:[%s841_s26 + $0x20] sm:$0xf]  ;;  %v548_v31 = vld [vmem:[%s841_s26 + $0x24] sm:$0xf0]  ;;  %v547_v32 = vld [vmem:[%s841_s26 + $0x24] sm:$0xf] }
  0x2a   : > { %322 = vmatpush.bf16.msra.mxu1 %v527_v11  ;;  %v492_v33 = vld [vmem:[%s841_s26 + $0x28] sm:$0xf0]  ;;  %v491_v34 = vor.u32 %v548_v31, %v490_v30  ;;  %v482_v36 = vld [vmem:[%s841_s26 + $0x10] sm:$0xf]  ;;  %v546_v37 = vld [vmem:[%s841_s26 + $0x14] sm:$0xf0] }
  0x2b   : > { %v495_v35 = vor.u32 %v547_v32, %v492_v33  ;;  %v545_v38 = vld [vmem:[%s841_s26 + $0x14] sm:$0xf]  ;;  %v484_v39 = vld [vmem:[%s841_s26 + $0x18] sm:$0xf0]  ;;  %v483_v40 = vor.u32 %v546_v37, %v482_v36  ;;  %v474_v42 = vld [vmem:[%s841_s26] sm:$0xf] }
  0x2c   : > { %v487_v41 = vor.u32 %v545_v38, %v484_v39  ;;  %v544_v43 = vld [vmem:[%s841_s26 + $0x4] sm:$0xf0]  ;;  %v543_v44 = vld [vmem:[%s841_s26 + $0x4] sm:$0xf]  ;;  %v476_v45 = vld [vmem:[%s841_s26 + $0x8] sm:$0xf0] }
  0x2d   : > { %309 = vmatpush.bf16.msra.mxu0 %v515_v16  ;;  %v475_v46 = vor.u32 %v544_v43, %v474_v42  ;;  %v479_v47 = vor.u32 %v543_v44, %v476_v45  ;;  %v542_v48 = vld [vmem:[%s921_s0] sm:$0xff]  ;;  %s559_s27 = sshll.u32 %s732_s12, 4  ;;  %s193_s28 = scalar_lea.vmem [#allocation5], %s467_s25 }
  0x2e   : > { %323 = vmatpush.bf16.msra.mxu1 %v519_v17  ;;  %s354_s3 = scalar_lea.hbm %s923_s2, %s559_s27  ;;  %s355_s4 = sshll.u32 %s193_s28, 4  ;;  %s356_s4 = int_to_ptr.vmem [resolvable:$true] %s355_s4 }
  0x2f   : > { %s357_s5 = sshll.u32 %s354_s3, 4  ;;  %s340_s6 = scalar_lea.sflag [#allocation4], %s837_s16  ;;  %s358_s5 = int_to_ptr.hbm [resolvable:$true] %s357_s5 }
  0x30   : > { %s672_s12 = sshra.s32 %s358_s5, 4  ;;  %s678_s18 = scalar_lea.hbm %s923_s2, 64  ;;  %s673_s12 = int_to_ptr.hbm [resolvable:$true] %s672_s12 }
  0x31   : > { %310 = vmatpush.bf16.msra.mxu0 %v507_v22  ;;  %s674_s7 = scalar_lea.hbm %s673_s12, 32  ;;  %p679_p7 = scmp.lt.s32.totalorder %s673_s12, %s923_s2 }
  0x32   : > { %324 = vmatpush.bf16.msra.mxu1 %v511_v23  ;;  %p675_p4 = scmp.ne.s32.totalorder %s673_s12, %s674_s7  ;;  %p680_p8 = scmp.lt.s32.totalorder %s678_s18, %s674_s7 }
  0x34   : > { %p676_p5 = pnand %p675_p4, %p814_p9  ;;  %p681_p10 = por %p680_p8, %p679_p7 }
  0x35   : > { %311 = vmatpush.bf16.msra.mxu0 %v499_v28 }
  0x36   : > { %325 = vmatpush.bf16.msra.mxu1 %v503_v29  ;;  %p677_p6 = pneg %p676_p5 }
  0x38   : > { %p682_p13 = pnand %p681_p10, %p677_p6 }
  0x39   : > { %312 = vmatpush.bf16.msra.mxu0 %v491_v34 }
  0x3a   : > { %326 = vmatpush.bf16.msra.mxu1 %v495_v35 }
  0x3d   : > { %313 = vmatpush.bf16.msra.mxu0 %v483_v40 }
  0x3e   : > { %327 = vmatpush.bf16.msra.mxu1 %v487_v41 }
  0x41   : > { %314 = vmatpush.bf16.msra.mxu0 %v475_v46 }
  0x42   : > { %328 = vmatpush.bf16.msra.mxu1 %v479_v47 }
  0x44   : > { %315 = vmatmul.bf16.vlgmr.msra.gmra.mxu0 %v542_v48 }
  0x45   : > { %329 = vmatmul.bf16.vlgmr.msra.gmra.mxu1 %v542_v48 }
  0xc1   : > { %v316_v49 = vpop.f32.mrf.mxu0 }
  0xc2   : > { %335 = vst [vmem:[%s193_s28] sm:$0xff] %v316_v49  ;;  %v330_v50 = vpop.f32.mrf.mxu1 }
  0xc3   : > { %336 = vst [vmem:[%s193_s28 + $0x8] sm:$0xff] %v330_v50 }
  0xc9   : > { %v318_v51 = vpop.f32.mrf.mxu0 }
  0xca   : > { %337 = vst [vmem:[%s193_s28 + $0x10] sm:$0xff] %v318_v51  ;;  %v332_v52 = vpop.f32.mrf.mxu1 }
  0xcb   : > { %338 = vst [vmem:[%s193_s28 + $0x18] sm:$0xff] %v332_v52 }
  0xcc   : > { %685 = shalt.err (!%p682_p13)
}
  0xcd   : > { %s745_s16 = smov 256   ;;  %s746_s19 = smov 512  }
  0xce   : > { %s747_s21 = smov 16  }
  0xcf   : > { %562 = dma.vmem_to_hbm [thread:$0]  (%p814_p9), %s356_s4, 512, %s358_s5, %s340_s6, %s745_s16, %s746_s19, %s747_s21  }
  0xd0 PF: > { %s372_s25 = sand.u32 1, %s720_s9   ;;  %p569_p0 = pnand %p461_p12, %p821_p11 }
  0xd1   : > { %s373_s27 = scalar_lea.sflag [#allocation4], %s372_s25 }
  0xd2   : > { %p570_p1 = pneg %p569_p0 }
  0xd4   : > { %715 = dma.done.wait (%p570_p1), %s373_s27, 512  }
  0xd5   : > { %717 = vsyncadd (%p570_p1), %s373_s27, 4294966784  ;;  %s18_s14 = sadd.s32 1, %s740_s14   ;;  %s928_s9 = smov %s724_s10 }
  0xd6   : > { %p15_p2 = scmp.ge.s32.totalorder %s18_s14, 4   ;;  %s929_s10 = smov %s728_s11 }
  0xd7   : > { %s930_s11 = smov %s819_s23  ;;  %s931_s12 = smov %s736_s13 }
  0xd8   : > { %s932_s13 = smov %s934_s17  ;;  %17 = sbr.rel (!%p15_p2) target bundleno = 6 (0x6), region = 76 }
  0xdd   :  { %379 = vsyncpa [#allocation3], 1 }
  0xde   :  { %381 = vsyncpa [#allocation3 + $0x1], 1 }
  0xdf   :  { %382 = vsyncpa [#allocation4], 1 }
  0xe0   :  { %384 = vsyncpa [#allocation4 + $0x1], 1 }

</bundles_post_ra>
